<compile_context>
chip_gen: v6e
topology: v6e:2x2x1
jax: 0.10.0
libtpu: 0.0.40
codegen_flags: <defaults>
</compile_context>

<pallas_src>
import functools
import math

import jax
import jax.numpy as jnp
from jax.experimental import pallas as pl
from jax.experimental.pallas import tpu as pltpu

_LOG_CLAMP = math.log(1e-4)          # reference clamps prob to [1e-4, 1.0]
_DEFAULT_TILE_ROWS = 4096            # ~2 MiB f32 pred block on the fast path
_VMEM_LIMIT = 48 * 1024 * 1024       # > 32 MiB scoped default, < v7x 64 MiB physical


def _round_up(x, m):
    return ((x + m - 1) // m) * m


def _focal_pow(one_minus_p, gamma):
    """(1 - p)^gamma; small integer gamma -> VPU multiplies instead of EUP pow."""
    if float(gamma) == int(gamma) and 0 <= int(gamma) <= 4:
        g = int(gamma)
        if g == 0:
            return jnp.ones_like(one_minus_p)
        out = one_minus_p
        for _ in range(g - 1):
            out = out * one_minus_p
        return out
    return jnp.power(one_minus_p, jnp.float32(gamma))


def _seg_reduce_bcast(x, seg, combine):
    """Reduce each group of `seg` consecutive lanes (last axis), broadcasting the
    group result back to every lane of the group.  `seg` must divide 128.
    log2(seg) cyclic-doubling steps; each step = 2 pltpu.roll (XLU) + 1 select."""
    if seg == 1:
        return x
    lanes = x.shape[-1]
    pos = jax.lax.broadcasted_iota(jnp.int32, x.shape, x.ndim - 1) % seg
    s = 1
    while s < seg:
        fwd = pltpu.roll(x, shift=lanes - s, axis=x.ndim - 1)   # lane i <- lane i + s
        wrap = pltpu.roll(x, shift=seg - s, axis=x.ndim - 1)    # lane i <- lane i + s - seg
        x = combine(x, jnp.where(pos < seg - s, fwd, wrap))
        s *= 2
    return x


# --------------------------------------------------------------------------
# Fast path: 128 % C == 0, samples packed along lanes (no wrapper transpose).
# --------------------------------------------------------------------------
def _focal_lanes_kernel(*refs, class_num, gamma, use_alpha, rows_total, tile_rows,
                        needs_mask):
    if use_alpha:
        pred_ref, tgt_ref, alpha_ref, out_ref = refs
    else:
        pred_ref, tgt_ref, out_ref = refs
        alpha_ref = None

    c = class_num
    x = pred_ref[...].astype(jnp.float32)                        # (tile_rows, 128)

    # per-sample (= per group of c lanes) numerically stable log-softmax
    m = _seg_reduce_bcast(x, c, jnp.maximum)
    shifted = x - m
    e = jnp.exp(shifted)
    log_denom = jnp.log(_seg_reduce_bcast(e, c, jnp.add))

    cls = jax.lax.broadcasted_iota(jnp.int32, x.shape, 1) % c    # 128 % c == 0
    onehot = cls == tgt_ref[...].astype(jnp.int32)

    # log-space clamp == log(clip(p, 1e-4, 1.0)); avoids a second per-lane log
    logp_c = jnp.maximum(shifted - log_denom, jnp.float32(_LOG_CLAMP))
    p = jnp.exp(logp_c)
    loss = _focal_pow(1.0 - p, gamma) * (-logp_c)
    if use_alpha:
        loss = loss * alpha_ref[...].astype(jnp.float32)         # (1, 128) broadcast
    loss = jnp.where(onehot, loss, 0.0)

    # lane-dense per-tile partial sums; tiny final reduce happens outside.
    out_ref[...] = jnp.sum(loss, axis=0, keepdims=True).reshape(out_ref.shape)

    if needs_mask:
        i = pl.program_id(0)

        @pl.when(i == pl.num_programs(0) - 1)
        def _():
            row = i * tile_rows + jax.lax.broadcasted_iota(jnp.int32, loss.shape, 0)
            masked = jnp.where(row < rows_total, loss, 0.0)
            out_ref[...] = jnp.sum(masked, axis=0, keepdims=True).reshape(out_ref.shape)


def _pick_tile_rows(rows_total, tile_rows):
    if tile_rows is not None:
        t = max(1, int(tile_rows))
        if t < rows_total:
            t = max(32, _round_up(t, 32))      # int8 target sublane tiling
        return min(rows_total, t)
    if rows_total <= 64:
        return rows_total                      # single small full-dim block
    # split so num_tiles >= 2 (v7x megacore) while capping block bytes
    return min(_DEFAULT_TILE_ROWS, _round_up((rows_total + 1) // 2, 32))


def _loss_sum_tail(pred_tail, tgt_tail, alpha_arr, gamma, use_alpha):
    """Remainder samples (< 128/C of them) that do not fill a 128-lane row."""
    logits = pred_tail.astype(jnp.float32)
    logp = jax.nn.log_softmax(logits, axis=-1)
    idx = tgt_tail.astype(jnp.int32)[:, None]
    logp_t = jnp.take_along_axis(logp, idx, axis=1)[:, 0]
    logp_c = jnp.maximum(logp_t, jnp.float32(_LOG_CLAMP))
    p = jnp.exp(logp_c)
    loss = _focal_pow(1.0 - p, gamma) * (-logp_c)
    if use_alpha:
        loss = loss * alpha_arr[idx[:, 0]]
    return jnp.sum(loss)


def _total_lanes(pred2, target_flat, class_num, alpha_arr, gamma, use_alpha,
                 tile_rows):
    n, c = pred2.shape
    rows_total = (n * c) // 128
    samples_main = (rows_total * 128) // c
    total = jnp.zeros((), jnp.float32)

    if rows_total > 0:
        flat = pred2.reshape(-1)
        if samples_main != n:
            # TODO(synk): non-128-aligned N*C needs one contiguous prefix-slice
            # copy; the aligned (common) case is copy-free.
            flat = flat[: rows_total * 128]
        pred_lanes = flat.reshape(rows_total, 128)               # free reshape
        tgt_lanes = jnp.repeat(
            target_flat[:samples_main].astype(jnp.int8), c).reshape(rows_total, 128)

        tile_r = _pick_tile_rows(rows_total, tile_rows)
        needs_mask = (rows_total % tile_r) != 0
        num_tiles = pl.cdiv(rows_total, tile_r)

        kernel = functools.partial(
            _focal_lanes_kernel, class_num=c, gamma=gamma, use_alpha=use_alpha,
            rows_total=rows_total, tile_rows=tile_r, needs_mask=needs_mask)

        in_specs = [pl.BlockSpec((tile_r, 128), lambda i: (i, 0)),
                    pl.BlockSpec((tile_r, 128), lambda i: (i, 0))]
        args = [pred_lanes, tgt_lanes]
        if use_alpha:
            alpha_lanes = jnp.tile(alpha_arr, 128 // c).reshape(1, 128)
            in_specs.append(pl.BlockSpec((1, 128), lambda i: (0, 0)))
            args.append(alpha_lanes)

        partials = pl.pallas_call(
            kernel,
            out_shape=jax.ShapeDtypeStruct((num_tiles, 1, 128), jnp.float32),
            grid_spec=pltpu.PrefetchScalarGridSpec(
                num_scalar_prefetch=0,
                grid=(num_tiles,),
                in_specs=in_specs,
                out_specs=pl.BlockSpec((1, 1, 128), lambda i: (i, 0, 0))),
            compiler_params=pltpu.CompilerParams(
                dimension_semantics=("parallel",),
                vmem_limit_bytes=_VMEM_LIMIT),
        )(*args)
        total = jnp.sum(partials)

    if samples_main < n:
        total = total + _loss_sum_tail(pred2[samples_main:],
                                       target_flat[samples_main:],
                                       alpha_arr, gamma, use_alpha)
    return total


# --------------------------------------------------------------------------
# Fallback: general class counts (128 % C != 0), class axis on sublanes.
# --------------------------------------------------------------------------
def _focal_cols_kernel(*refs, gamma, use_alpha, total_n, tile_n, needs_mask):
    if use_alpha:
        pred_ref, tgt_ref, alpha_ref, out_ref = refs
    else:
        pred_ref, tgt_ref, out_ref = refs
        alpha_ref = None

    logits = pred_ref[...].astype(jnp.float32)                   # (C, tile_n)
    m = jnp.max(logits, axis=0, keepdims=True)
    shifted = logits - m
    log_denom = jnp.log(jnp.sum(jnp.exp(shifted), axis=0, keepdims=True))

    cls = jax.lax.broadcasted_iota(jnp.int32, logits.shape, 0)
    onehot = cls == tgt_ref[...].astype(jnp.int32)               # (C, tile_n)
    tgt_shift = jnp.sum(jnp.where(onehot, shifted, 0.0), axis=0, keepdims=True)

    logp_c = jnp.maximum(tgt_shift - log_denom, jnp.float32(_LOG_CLAMP))
    p = jnp.exp(logp_c)
    loss_col = _focal_pow(1.0 - p, gamma) * (-logp_c)            # (1, tile_n)
    if use_alpha:
        alpha_t = jnp.sum(jnp.where(onehot, alpha_ref[...].astype(jnp.float32), 0.0),
                          axis=0, keepdims=True)
        loss_col = loss_col * alpha_t

    lane = jax.lax.broadcasted_iota(jnp.int32, out_ref.shape, 2)

    def _store(val):
        out_ref[...] = jnp.where(lane == 0, val, 0.0)

    _store(jnp.sum(loss_col))
    if needs_mask:
        i = pl.program_id(0)

        @pl.when(i == pl.num_programs(0) - 1)
        def _():
            col = i * tile_n + jax.lax.broadcasted_iota(jnp.int32, loss_col.shape, 1)
            _store(jnp.sum(jnp.where(col < total_n, loss_col, 0.0)))


def _pick_tile_cols(n, class_num, tile_cols):
    n_pad = _round_up(max(n, 1), 128)
    if tile_cols is not None:
        return min(n_pad, max(128, _round_up(int(tile_cols), 128)))
    # ~512K f32 elements (~2 MiB) per pred block; shrink lane extent as C grows.
    t = max(128, min(1 << 16, ((1 << 19) // max(class_num, 1)) // 128 * 128))
    if t >= n_pad:
        t = n_pad if n_pad < 256 else _round_up(n_pad // 2, 128)
    return t


def _total_cols(pred2, target_flat, class_num, alpha_arr, gamma, use_alpha,
                tile_cols):
    n, c = pred2.shape
    # The transpose is one extra HBM pass; only taken when 128 % C != 0.
    # TODO(synk): for very large C, chunk the class axis with an online max/sum
    # (flash-softmax style) instead of materializing the whole (C, tile_n) tile.
    pred_t = jnp.transpose(pred2)                                # (C, N)
    tgt_dtype = jnp.int8 if class_num <= 127 else jnp.int32
    tgt = target_flat.reshape(1, -1).astype(tgt_dtype)           # (1, N)

    tile_n = _pick_tile_cols(n, class_num, tile_cols)
    needs_mask = (n % tile_n) != 0
    num_tiles = pl.cdiv(n, tile_n)

    kernel = functools.partial(_focal_cols_kernel, gamma=gamma, use_alpha=use_alpha,
                               total_n=n, tile_n=tile_n, needs_mask=needs_mask)

    in_specs = [pl.BlockSpec((c, tile_n), lambda i: (0, i)),
                pl.BlockSpec((1, tile_n), lambda i: (0, i))]
    args = [pred_t, tgt]
    if use_alpha:
        in_specs.append(pl.BlockSpec((c, 1), lambda i: (0, 0)))
        args.append(alpha_arr.reshape(c, 1))

    partials = pl.pallas_call(
        kernel,
        out_shape=jax.ShapeDtypeStruct((num_tiles, 1, 128), jnp.float32),
        grid_spec=pltpu.PrefetchScalarGridSpec(
            num_scalar_prefetch=0,
            grid=(num_tiles,),
            in_specs=in_specs,
            out_specs=pl.BlockSpec((1, 1, 128), lambda i: (i, 0, 0))),
        compiler_params=pltpu.CompilerParams(
            dimension_semantics=("parallel",),
            vmem_limit_bytes=_VMEM_LIMIT),
    )(*args)
    return jnp.sum(partials)


# --------------------------------------------------------------------------
# Public entry point
# --------------------------------------------------------------------------
def focal_loss(pred, target, *, class_num, alpha=None, gamma=2.0, use_alpha=False,
               size_average=True, tile_rows=None, tile_cols=None):
    """Pallas TPU forward of FocalLoss. Returns a scalar float32."""
    pred2 = pred.reshape(-1, class_num)            # mirrors pred.view(-1, C)
    n = pred2.shape[0]
    target_flat = target.reshape(-1)
    alpha_arr = (jnp.asarray(alpha, dtype=jnp.float32).reshape(class_num)
                 if use_alpha else None)
    gamma = float(gamma)

    if 128 % class_num == 0:
        total = _total_lanes(pred2, target_flat, class_num, alpha_arr, gamma,
                             use_alpha, tile_rows)
    else:
        total = _total_cols(pred2, target_flat, class_num, alpha_arr, gamma,
                            use_alpha, tile_cols)
    if size_average:
        return total / jnp.float32(n)
    return total


def _reference(pred, target, class_num, gamma=2.0, alpha=None, use_alpha=False,
               size_average=True):
    prob = jax.nn.softmax(pred.reshape(-1, class_num).astype(jnp.float32), axis=1)
    prob = jnp.clip(prob, 1e-4, 1.0)
    onehot = jax.nn.one_hot(target.reshape(-1), class_num, dtype=jnp.float32)
    a = (jnp.asarray(alpha, jnp.float32).reshape(1, class_num)
         if use_alpha else jnp.ones((1, class_num), jnp.float32))
    batch_loss = jnp.sum(-a * jnp.power(1.0 - prob, gamma) * jnp.log(prob) * onehot,
                         axis=1)
    return jnp.mean(batch_loss) if size_average else jnp.sum(batch_loss)


if __name__ == "__main__":
    key = jax.random.PRNGKey(0)
    k1, k2, k3, k4, k5, k6, k7, k8 = jax.random.split(key, 8)

    # 1) fast path, aligned (N=512, C=4), mean, no alpha, single tile
    C = 4
    pred1 = jax.random.normal(k1, (2, 16, 16, C), dtype=jnp.float32)
    tgt1 = jax.random.randint(k2, (2, 16, 16), 0, C, dtype=jnp.int32)
    out1 = focal_loss(pred1, tgt1, class_num=C, gamma=2.0)
    jax.block_until_ready(out1)
    ref1 = _reference(pred1, tgt1, C, gamma=2.0)
    assert jnp.allclose(out1, ref1, rtol=1e-5, atol=1e-6), (out1, ref1)

    # 2) fast path, multi-tile parallel grid with ragged last tile + alpha
    pred2 = jax.random.normal(k3, (2, 40, 40, C), dtype=jnp.float32)
    tgt2 = jax.random.randint(k4, (2, 40, 40), 0, C, dtype=jnp.int32)
    alpha4 = [0.25, 0.5, 0.75, 1.0]
    out2 = focal_loss(pred2, tgt2, class_num=C, gamma=2.0, alpha=alpha4,
                      use_alpha=True, tile_rows=32)
    jax.block_until_ready(out2)
    ref2 = _reference(pred2, tgt2, C, gamma=2.0, alpha=alpha4, use_alpha=True)
    assert jnp.allclose(out2, ref2, rtol=1e-5, atol=1e-6), (out2, ref2)

    # 3) fast path with JAX tail for a non-128-aligned N*C (N=126), sum reduction
    pred3 = jax.random.normal(k5, (2, 7, 9, C), dtype=jnp.float32)
    tgt3 = jax.random.randint(k6, (2, 7, 9), 0, C, dtype=jnp.int32)
    out3 = focal_loss(pred3, tgt3, class_num=C, gamma=2.0, size_average=False)
    jax.block_until_ready(out3)
    ref3 = _reference(pred3, tgt3, C, gamma=2.0, size_average=False)
    assert jnp.allclose(out3, ref3, rtol=1e-5, atol=1e-5), (out3, ref3)

    # 4) fallback path (C=6 does not divide 128), alpha, mean
    C6 = 6
    pred4 = jax.random.normal(k7, (2, 5, 8, C6), dtype=jnp.float32)
    tgt4 = jax.random.randint(k8, (2, 5, 8), 0, C6, dtype=jnp.int32)
    alpha6 = [0.1, 0.2, 0.3, 0.4, 0.5, 0.6]
    out4 = focal_loss(pred4, tgt4, class_num=C6, gamma=2.0, alpha=alpha6,
                      use_alpha=True)
    jax.block_until_ready(out4)
    ref4 = _reference(pred4, tgt4, C6, gamma=2.0, alpha=alpha6, use_alpha=True)
    assert jnp.allclose(out4, ref4, rtol=1e-5, atol=1e-6), (out4, ref4)

    # 5) bf16 logits pass straight through the DMA, upcast in-kernel
    pred5 = pred1.astype(jnp.bfloat16)
    out5 = focal_loss(pred5, tgt1, class_num=C, gamma=2.0)
    jax.block_until_ready(out5)
    ref5 = _reference(pred5.astype(jnp.float32), tgt1, C, gamma=2.0)
    assert jnp.allclose(out5, ref5, rtol=1e-5, atol=1e-6), (out5, ref5)

    print("KERNEL_OK")
</pallas_src>

<mosaic_0001>
module attributes {stable_mosaic.version = 11 : i64} {
  func.func @_focal_lanes_kernel(%arg0: i32, %arg1: memref<16x128xf32, #tpu.memory_space<vmem>>, %arg2: memref<16x128xi8, #tpu.memory_space<vmem>>, %arg3: memref<1x1x128xf32, #tpu.memory_space<vmem>>) attributes {dimension_semantics = [#tpu.dimension_semantics<parallel>], iteration_bounds = array<i64: 1>, scalar_prefetch = 0 : i64, scratch_operands = 0 : i64, tpu.core_type = #tpu.core_type<tc>, window_params = [{transform_indices = @transform_0, window_bounds = array<i64: 16, 128>}, {transform_indices = @transform_1, window_bounds = array<i64: 16, 128>}, {transform_indices = @transform_2, window_bounds = array<i64: 1, 1, 128>}]} {
    %c0 = arith.constant 0 : index
    %c0_0 = arith.constant 0 : index
    %0 = vector.load %arg1[%c0, %c0_0] : memref<16x128xf32, #tpu.memory_space<vmem>>, vector<16x128xf32>
    %1 = tpu.iota {dimensions = array<i32: 1>} : vector<16x128xi32>
    %c4_i32 = arith.constant 4 : i32
    %c0_i32 = arith.constant 0 : i32
    %2 = arith.cmpi eq, %c4_i32, %c0_i32 : i32
    %c1_i32 = arith.constant 1 : i32
    %3 = arith.select %2, %c1_i32, %c4_i32 : i32
    %4 = vector.broadcast %3 : i32 to vector<16x128xi32>
    %5 = arith.remsi %1, %4 : vector<16x128xi32>
    %c0_i32_1 = arith.constant 0 : i32
    %6 = vector.broadcast %c0_i32_1 : i32 to vector<16x128xi32>
    %7 = arith.cmpi ne, %5, %6 : vector<16x128xi32>
    %c0_i32_2 = arith.constant 0 : i32
    %8 = vector.broadcast %c0_i32_2 : i32 to vector<16x128xi32>
    %9 = arith.cmpi slt, %5, %8 : vector<16x128xi32>
    %c0_i32_3 = arith.constant 0 : i32
    %10 = arith.cmpi slt, %3, %c0_i32_3 : i32
    %11 = vector.broadcast %10 : i1 to vector<16x128xi1>
    %12 = vector.broadcast %11 : vector<16x128xi1> to vector<16x128xi1>
    %13 = arith.xori %9, %12 : vector<16x128xi1>
    %14 = arith.andi %13, %7 : vector<16x128xi1>
    %15 = vector.broadcast %3 : i32 to vector<16x128xi32>
    %16 = arith.addi %5, %15 : vector<16x128xi32>
    %17 = arith.select %14, %16, %5 : vector<16x128xi1>, vector<16x128xi32>
    %c127_i32 = arith.constant 127 : i32
    %18 = tpu.dynamic_rotate %0 by %c127_i32 dim 1 : vector<16x128xf32>, i32 -> vector<16x128xf32>
    %c3_i32 = arith.constant 3 : i32
    %19 = tpu.dynamic_rotate %0 by %c3_i32 dim 1 : vector<16x128xf32>, i32 -> vector<16x128xf32>
    %c3_i32_4 = arith.constant 3 : i32
    %20 = vector.broadcast %c3_i32_4 : i32 to vector<16x128xi32>
    %21 = arith.cmpi slt, %17, %20 : vector<16x128xi32>
    %22 = arith.select %21, %18, %19 : vector<16x128xi1>, vector<16x128xf32>
    %23 = arith.maximumf %0, %22 : vector<16x128xf32>
    %c126_i32 = arith.constant 126 : i32
    %24 = tpu.dynamic_rotate %23 by %c126_i32 dim 1 : vector<16x128xf32>, i32 -> vector<16x128xf32>
    %c2_i32 = arith.constant 2 : i32
    %25 = tpu.dynamic_rotate %23 by %c2_i32 dim 1 : vector<16x128xf32>, i32 -> vector<16x128xf32>
    %c2_i32_5 = arith.constant 2 : i32
    %26 = vector.broadcast %c2_i32_5 : i32 to vector<16x128xi32>
    %27 = arith.cmpi slt, %17, %26 : vector<16x128xi32>
    %28 = arith.select %27, %24, %25 : vector<16x128xi1>, vector<16x128xf32>
    %29 = arith.maximumf %23, %28 : vector<16x128xf32>
    %30 = arith.subf %0, %29 : vector<16x128xf32>
    %31 = math.exp %30 : vector<16x128xf32>
    %32 = tpu.iota {dimensions = array<i32: 1>} : vector<16x128xi32>
    %c4_i32_6 = arith.constant 4 : i32
    %c0_i32_7 = arith.constant 0 : i32
    %33 = arith.cmpi eq, %c4_i32_6, %c0_i32_7 : i32
    %c1_i32_8 = arith.constant 1 : i32
    %34 = arith.select %33, %c1_i32_8, %c4_i32_6 : i32
    %35 = vector.broadcast %34 : i32 to vector<16x128xi32>
    %36 = arith.remsi %32, %35 : vector<16x128xi32>
    %c0_i32_9 = arith.constant 0 : i32
    %37 = vector.broadcast %c0_i32_9 : i32 to vector<16x128xi32>
    %38 = arith.cmpi ne, %36, %37 : vector<16x128xi32>
    %c0_i32_10 = arith.constant 0 : i32
    %39 = vector.broadcast %c0_i32_10 : i32 to vector<16x128xi32>
    %40 = arith.cmpi slt, %36, %39 : vector<16x128xi32>
    %c0_i32_11 = arith.constant 0 : i32
    %41 = arith.cmpi slt, %34, %c0_i32_11 : i32
    %42 = vector.broadcast %41 : i1 to vector<16x128xi1>
    %43 = vector.broadcast %42 : vector<16x128xi1> to vector<16x128xi1>
    %44 = arith.xori %40, %43 : vector<16x128xi1>
    %45 = arith.andi %44, %38 : vector<16x128xi1>
    %46 = vector.broadcast %34 : i32 to vector<16x128xi32>
    %47 = arith.addi %36, %46 : vector<16x128xi32>
    %48 = arith.select %45, %47, %36 : vector<16x128xi1>, vector<16x128xi32>
    %c127_i32_12 = arith.constant 127 : i32
    %49 = tpu.dynamic_rotate %31 by %c127_i32_12 dim 1 : vector<16x128xf32>, i32 -> vector<16x128xf32>
    %c3_i32_13 = arith.constant 3 : i32
    %50 = tpu.dynamic_rotate %31 by %c3_i32_13 dim 1 : vector<16x128xf32>, i32 -> vector<16x128xf32>
    %c3_i32_14 = arith.constant 3 : i32
    %51 = vector.broadcast %c3_i32_14 : i32 to vector<16x128xi32>
    %52 = arith.cmpi slt, %48, %51 : vector<16x128xi32>
    %53 = arith.select %52, %49, %50 : vector<16x128xi1>, vector<16x128xf32>
    %54 = arith.addf %31, %53 : vector<16x128xf32>
    %c126_i32_15 = arith.constant 126 : i32
    %55 = tpu.dynamic_rotate %54 by %c126_i32_15 dim 1 : vector<16x128xf32>, i32 -> vector<16x128xf32>
    %c2_i32_16 = arith.constant 2 : i32
    %56 = tpu.dynamic_rotate %54 by %c2_i32_16 dim 1 : vector<16x128xf32>, i32 -> vector<16x128xf32>
    %c2_i32_17 = arith.constant 2 : i32
    %57 = vector.broadcast %c2_i32_17 : i32 to vector<16x128xi32>
    %58 = arith.cmpi slt, %48, %57 : vector<16x128xi32>
    %59 = arith.select %58, %55, %56 : vector<16x128xi1>, vector<16x128xf32>
    %60 = arith.addf %54, %59 : vector<16x128xf32>
    %61 = math.log %60 : vector<16x128xf32>
    %62 = tpu.iota {dimensions = array<i32: 1>} : vector<16x128xi32>
    %c4_i32_18 = arith.constant 4 : i32
    %c0_i32_19 = arith.constant 0 : i32
    %63 = arith.cmpi eq, %c4_i32_18, %c0_i32_19 : i32
    %c1_i32_20 = arith.constant 1 : i32
    %64 = arith.select %63, %c1_i32_20, %c4_i32_18 : i32
    %65 = vector.broadcast %64 : i32 to vector<16x128xi32>
    %66 = arith.remsi %62, %65 : vector<16x128xi32>
    %c0_i32_21 = arith.constant 0 : i32
    %67 = vector.broadcast %c0_i32_21 : i32 to vector<16x128xi32>
    %68 = arith.cmpi ne, %66, %67 : vector<16x128xi32>
    %c0_i32_22 = arith.constant 0 : i32
    %69 = vector.broadcast %c0_i32_22 : i32 to vector<16x128xi32>
    %70 = arith.cmpi slt, %66, %69 : vector<16x128xi32>
    %c0_i32_23 = arith.constant 0 : i32
    %71 = arith.cmpi slt, %64, %c0_i32_23 : i32
    %72 = vector.broadcast %71 : i1 to vector<16x128xi1>
    %73 = vector.broadcast %72 : vector<16x128xi1> to vector<16x128xi1>
    %74 = arith.xori %70, %73 : vector<16x128xi1>
    %75 = arith.andi %74, %68 : vector<16x128xi1>
    %76 = vector.broadcast %64 : i32 to vector<16x128xi32>
    %77 = arith.addi %66, %76 : vector<16x128xi32>
    %78 = arith.select %75, %77, %66 : vector<16x128xi1>, vector<16x128xi32>
    %c0_24 = arith.constant 0 : index
    %c0_25 = arith.constant 0 : index
    %79 = vector.load %arg2[%c0_24, %c0_25] : memref<16x128xi8, #tpu.memory_space<vmem>>, vector<16x128xi8>
    %80 = arith.extsi %79 : vector<16x128xi8> to vector<16x128xi32>
    %81 = arith.cmpi eq, %78, %80 : vector<16x128xi32>
    %82 = arith.subf %30, %61 : vector<16x128xf32>
    %cst = arith.constant -9.21034049 : f32
    %83 = vector.broadcast %cst : f32 to vector<16x128xf32>
    %84 = arith.maximumf %82, %83 : vector<16x128xf32>
    %85 = math.exp %84 : vector<16x128xf32>
    %cst_26 = arith.constant 1.000000e+00 : f32
    %86 = vector.broadcast %cst_26 : f32 to vector<16x128xf32>
    %87 = arith.subf %86, %85 : vector<16x128xf32>
    %88 = arith.mulf %87, %87 : vector<16x128xf32>
    %cst_27 = arith.constant 0.000000e+00 : f32
    %89 = vector.broadcast %cst_27 : f32 to vector<16x128xf32>
    %90 = arith.subf %89, %84 : vector<16x128xf32>
    %91 = arith.mulf %88, %90 : vector<16x128xf32>
    %cst_28 = arith.constant 0.000000e+00 : f32
    %92 = vector.broadcast %cst_28 : f32 to vector<16x128xf32>
    %93 = arith.select %81, %91, %92 : vector<16x128xi1>, vector<16x128xf32>
    %cst_29 = arith.constant dense<0.000000e+00> : vector<128xf32>
    %94 = vector.multi_reduction <add>, %93, %cst_29 [0] : vector<16x128xf32> to vector<128xf32>
    %95 = vector.shape_cast %94 : vector<128xf32> to vector<1x128xf32>
    %96 = vector.shape_cast %95 : vector<1x128xf32> to vector<1x1x128xf32>
    %c0_30 = arith.constant 0 : index
    %c0_31 = arith.constant 0 : index
    %c0_32 = arith.constant 0 : index
    %97 = vector.load %arg3[%c0_30, %c0_31, %c0_32] : memref<1x1x128xf32, #tpu.memory_space<vmem>>, vector<1x1x128xf32>
    tpu.vector_store %arg3[%c0_30, %c0_31, %c0_32], %96 {strides = array<i32>} : memref<1x1x128xf32, #tpu.memory_space<vmem>>, vector<1x1x128xf32>,
    return
  }
  func.func @transform_0(%arg0: i32) -> (i32, i32) {
    %c0_i32 = arith.constant 0 : i32
    %c0_i32_0 = arith.constant 0 : i32
    return %arg0, %c0_i32 : i32, i32
  }
  func.func @transform_1(%arg0: i32) -> (i32, i32) {
    %c0_i32 = arith.constant 0 : i32
    %c0_i32_0 = arith.constant 0 : i32
    return %arg0, %c0_i32 : i32, i32
  }
  func.func @transform_2(%arg0: i32) -> (i32, i32, i32) {
    %c0_i32 = arith.constant 0 : i32
    %c0_i32_0 = arith.constant 0 : i32
    %c0_i32_1 = arith.constant 0 : i32
    return %arg0, %c0_i32, %c0_i32_0 : i32, i32, i32
  }
}

</mosaic_0001>

<bundles_post_ra>
// kernel: tpu_custom_call.1
= control target key start
LH: loop header
LB: loop body
LE: loop exit
PB: predicated region body
PF: predicated region fallthrough
CT: control target
= control target key end

     0   :  { %7 = vsyncpa [#allocation3], 0  ;;  %s329_s0 = inlined_call_operand.hbm [shape: f32[16,128], index: 0, kind: input, shape index: {}]   ;;  %s330_s1 = inlined_call_operand.hbm [shape: s8[16,128], index: 1, kind: input, shape index: {}]   ;;  %s331_s2 = inlined_call_operand.hbm [shape: f32[1,1,128], index: 2, kind: output, shape index: {}]  }
   0x1   :  { %8 = vsyncpa [#allocation6], 0 }
   0x2   :  { %9 = vsyncpa [#allocation4], 0  ;;  %s256_s9 = smov [#allocation2]  }
   0x3   :  { %s15_s10 = sshll.u32 %s256_s9, 4  ;;  %s16_s10 = int_to_ptr.vmem [resolvable:$true] %s15_s10 }
   0x4   :  { %s198_s11 = scalar_lea.vmem %s16_s10, 256  ;;  %p203_p1 = scmp.lt.s32.totalorder %s16_s10, %s16_s10 }
   0x5   :  { %p199_p0 = scmp.ne.s32.totalorder %s16_s10, %s198_s11  ;;  %p204_p2 = scmp.lt.s32.totalorder %s198_s11, %s198_s11 }
   0x7   :  { %p205_p3 = por %p204_p2, %p203_p1 }
   0x9   :  { %p206_p4 = pnand %p205_p3, %p199_p0 }
   0xb   :  { %209 = shalt.err (!%p206_p4)
}
   0xc   :  { %s257_s12 = smov 128   ;;  %s258_s13 = smov 8  }
   0xd   :  { %21 = dma.hbm_to_vmem [thread:$0]  %s329_s0, 256, %s16_s10, [#allocation3], %s257_s12, %s257_s12, %s258_s13  }
   0xe   :  { %s259_s16 = smov [#allocation5]  }
   0xf   :  { %s27_s17 = sshll.u32 %s259_s16, 4  ;;  %s28_s17 = int_to_ptr.vmem [resolvable:$true] %s27_s17 }
  0x10   :  { %s218_s18 = scalar_lea.vmem %s28_s17, 64  ;;  %p223_p6 = scmp.lt.s32.totalorder %s28_s17, %s28_s17 }
  0x11   :  { %p219_p5 = scmp.ne.s32.totalorder %s28_s17, %s218_s18  ;;  %p224_p7 = scmp.lt.s32.totalorder %s218_s18, %s218_s18 }
  0x13   :  { %p225_p8 = por %p224_p7, %p223_p6 }
  0x15   :  { %p226_p9 = pnand %p225_p8, %p219_p5 }
  0x17   :  { %229 = shalt.err (!%p226_p9)
}
  0x18   :  { %s260_s19 = smov 32   ;;  %s261_s20 = smov 2  }
  0x19   :  { %33 = dma.hbm_to_vmem [thread:$0]  %s330_s1, 64, %s28_s17, [#allocation6], %s260_s19, %s260_s19, %s261_s20  }
  0x1a   :  { %250 = dma.done.wait [#allocation3], 256  }
  0x1b   :  { %251 = vsyncadd [#allocation3], 4294967040 }
  0x1c   :  { %252 = dma.done.wait [#allocation6], 64  }
  0x1d   :  { %253 = vsyncadd [#allocation6], 4294967232  ;;  %v40_v0 = vld [vmem:[#allocation2] sm:$0xff]  ;;  %s262_s0 = smov 3   ;;  %s263_s23 = smov 127   ;;  %v41_v1 = vld [vmem:[#allocation2 + $0x8] sm:$0xff]  ;;  %v42_v2 = vlaneseq }
  0x1e   :  { %60 = vrot.lane.b32.xlu1 %v40_v0, %s262_s0  ;;  %56 = vrot.lane.b32.xlu0 %v40_v0, %s263_s23  ;;  %s264_s1 = smov 126   ;;  %v165_v54 = vld [vmem:[#allocation5] sm:$0xf]   ;;  %s265_s24 = smov [#allocation7]  }
  0x1f   :  { %v43_v3 = vand.u32 127, %v42_v2  ;;  %v166_v58 = vunpack.c.0.s8 %v165_v54  ;;  %v167_v59 = vunpack.c.1.s8 %v165_v54  ;;  %s154_s25 = sshll.u32 %s265_s24, 4  ;;  %s155_s25 = int_to_ptr.vmem [resolvable:$true] %s154_s25 }
  0x20   :  { %s230_s26 = scalar_lea.vmem %s155_s25, 16  ;;  %s234_s27 = scalar_lea.vmem %s155_s25, 32 }
  0x21   :  { %v292_v4 = vand.u32 3, %v43_v3  ;;  %p231_p10 = scmp.ne.s32.totalorder %s155_s25, %s230_s26  ;;  %p235_p11 = scmp.lt.s32.totalorder %s155_s25, %s155_s25 }
  0x22   :  { %62 = vrot.lane.b32.xlu1 %v41_v1, %s262_s0  ;;  %58 = vrot.lane.b32.xlu0 %v41_v1, %s263_s23  ;;  %p236_p12 = scmp.lt.s32.totalorder %s234_s27, %s230_s26 }
  0x23   :  { %vm64_vm0 = vcmp.lt.s32.totalorder %v292_v4, 3  ;;  %vm77_vm1 = vcmp.lt.s32.totalorder %v292_v4, 2  ;;  %vm120_vm2 = vcmp.eq.s32.totalorder %v292_v4, %v166_v58  ;;  %vm121_vm3 = vcmp.eq.s32.totalorder %v292_v4, %v167_v59 }
  0x24   :  { %p237_p13 = por %p236_p12, %p235_p11 }
  0x26   :  { %p238_p0 = pnand %p237_p13, %p231_p10 }
  0x90   :  { %v61_v5 = vpop.permute.xlu1 %60  ;;  %v57_v6 = vpop.permute.xlu0 %56 }
  0x91   :  { %v65_v7 = vsel %vm64_vm0, %v57_v6, %v61_v5 }
  0x92   :  { %v67_v8 = vmax.f32 %v40_v0, %v65_v7 }
  0x94   :  { %v63_v9 = vpop.permute.xlu1 %62  ;;  %69 = vrot.lane.b32.xlu0 %v67_v8, %s264_s1  ;;  %v59_v10 = vpop.permute.xlu0 %58 }
  0x95   :  { %v66_v11 = vsel %vm64_vm0, %v59_v10, %v63_v9 }
  0x96   :  { %v68_v12 = vmax.f32 %v41_v1, %v66_v11 }
  0x98   :  { %73 = vrot.lane.b32.xlu0 %v67_v8, %s261_s20  ;;  %71 = vrot.lane.b32.xlu1 %v68_v12, %s264_s1 }
  0x9c   :  { %75 = vrot.lane.b32.xlu1 %v68_v12, %s261_s20 }
 0x106   :  { %v70_v13 = vpop.permute.xlu0 %69 }
 0x10a   :  { %v72_v14 = vpop.permute.xlu1 %71  ;;  %v74_v15 = vpop.permute.xlu0 %73 }
 0x10b   :  { %v78_v16 = vsel %vm77_vm1, %v70_v13, %v74_v15 }
 0x10c   :  { %v80_v17 = vmax.f32 %v67_v8, %v78_v16 }
 0x10e   :  { %v82_v18 = vsub.f32 %v40_v0, %v80_v17  ;;  %v76_v19 = vpop.permute.xlu1 %75 }
 0x10f   :  { %v79_v20 = vsel %vm77_vm1, %v72_v14, %v76_v19 }
 0x110   :  { %v84_v21 = vmul.f32 1.442695, %v82_v18  ;;  %v81_v22 = vmax.f32 %v68_v12, %v79_v20 }
 0x112   :  { %178 = vpow2.f32 %v84_v21  ;;  %v83_v23 = vsub.f32 %v41_v1, %v81_v22 }
 0x114   :  { %v86_v24 = vmul.f32 1.442695, %v83_v23 }
 0x116   :  { %180 = vpow2.f32 %v86_v24 }
 0x11f   :  { %v179_v25 = vpop.eup %178 }
 0x120   :  { %88 = vrot.lane.b32.xlu0 %v179_v25, %s263_s23 }
 0x123   :  { %v181_v26 = vpop.eup %180 }
 0x124   :  { %90 = vrot.lane.b32.xlu1 %v181_v26, %s263_s23  ;;  %92 = vrot.lane.b32.xlu0 %v179_v25, %s262_s0 }
 0x128   :  { %94 = vrot.lane.b32.xlu1 %v181_v26, %s262_s0 }
 0x192   :  { %v89_v27 = vpop.permute.xlu0 %88 }
 0x196   :  { %v91_v28 = vpop.permute.xlu1 %90  ;;  %v93_v29 = vpop.permute.xlu0 %92 }
 0x197   :  { %v96_v30 = vsel %vm64_vm0, %v89_v27, %v93_v29 }
 0x198   :  { %v98_v31 = vadd.f32 %v179_v25, %v96_v30 }
 0x19a   :  { %v95_v32 = vpop.permute.xlu1 %94  ;;  %100 = vrot.lane.b32.xlu0 %v98_v31, %s264_s1 }
 0x19b   :  { %v97_v33 = vsel %vm64_vm0, %v91_v28, %v95_v32 }
 0x19c   :  { %v99_v34 = vadd.f32 %v181_v26, %v97_v33 }
 0x19e   :  { %102 = vrot.lane.b32.xlu1 %v99_v34, %s264_s1  ;;  %104 = vrot.lane.b32.xlu0 %v98_v31, %s261_s20 }
 0x1a2   :  { %106 = vrot.lane.b32.xlu1 %v99_v34, %s261_s20 }
 0x20c   :  { %v101_v35 = vpop.permute.xlu0 %100 }
 0x210   :  { %v103_v36 = vpop.permute.xlu1 %102  ;;  %v105_v37 = vpop.permute.xlu0 %104 }
 0x211   :  { %v108_v38 = vsel %vm77_vm1, %v101_v35, %v105_v37 }
 0x212   :  { %v110_v39 = vadd.f32 %v108_v38, %v98_v31 }
 0x214   :  { %182 = vlog2.f32 %v110_v39  ;;  %v107_v40 = vpop.permute.xlu1 %106 }
 0x215   :  { %v109_v41 = vsel %vm77_vm1, %v103_v36, %v107_v40 }
 0x216   :  { %v111_v42 = vadd.f32 %v109_v41, %v99_v34 }
 0x218   :  { %184 = vlog2.f32 %v111_v42 }
 0x221   :  { %v183_v43 = vpop.eup %182 }
 0x222   :  { %v113_v44 = vmul.f32 0.6931472, %v183_v43 }
 0x224   :  { %v122_v45 = vsub.f32 %v82_v18, %v113_v44 }
 0x225   :  { %v185_v46 = vpop.eup %184 }
 0x226   :  { %v124_v47 = vmax.f32 %v122_v45, -9.2103405  ;;  %v115_v48 = vmul.f32 0.6931472, %v185_v46 }
 0x228   :  { %v126_v49 = vmul.f32 1.442695, %v124_v47  ;;  %v123_v50 = vsub.f32 %v83_v23, %v115_v48  ;;  %v134_v60 = vsub.f32 0.0, %v124_v47 }
 0x22a   :  { %186 = vpow2.f32 %v126_v49  ;;  %v125_v51 = vmax.f32 %v123_v50, -9.2103405 }
 0x22c   :  { %v128_v52 = vmul.f32 1.442695, %v125_v51  ;;  %v135_v62 = vsub.f32 0.0, %v125_v51 }
 0x22e   :  { %188 = vpow2.f32 %v128_v52 }
 0x237   :  { %v187_v53 = vpop.eup %186 }
 0x238   :  { %v130_v55 = vsub.f32 1.0, %v187_v53 }
 0x23a   :  { %v132_v56 = vmul.f32 %v130_v55, %v130_v55 }
 0x23b   :  { %v189_v57 = vpop.eup %188 }
 0x23c   :  { %v131_v61 = vsub.f32 1.0, %v189_v57  ;;  %v136_v0 = vmul.f32 %v134_v60, %v132_v56 }
 0x23e   :  { %v133_v63 = vmul.f32 %v131_v61, %v131_v61  ;;  %v138_v2 = vsel %vm120_vm2, %v136_v0, 0.0 }
 0x240   :  { %v137_v1 = vmul.f32 %v135_v62, %v133_v63 }
 0x242   :  { %v139_v3 = vsel %vm121_vm3, %v137_v1, 0.0 }
 0x243   :  { %v140_v5 = vadd.f32 %v139_v3, %v138_v2 }
 0x245   :  { %v141_v6 = vrot.slane %v140_v5, 4 }
 0x247   :  { %v142_v7 = vadd.f32 %v141_v6, %v140_v5 }
 0x249   :  { %v143_v8 = vrot.slane %v142_v7, 2 }
 0x24b   :  { %v144_v9 = vadd.f32 %v143_v8, %v142_v7 }
 0x24d   :  { %v145_v10 = vrot.slane %v144_v9, 1 }
 0x24f   :  { %v146_v11 = vadd.f32 %v145_v10, %v144_v9 }
 0x251   :  { %147 = vst [vmem:[#allocation7] sm:$0x1] %v146_v11 }
 0x252   :  { %241 = shalt.err (!%p238_p0)
}
 0x253   :  { %157 = dma.vmem_to_hbm [thread:$0]  %s155_s25, 16, %s331_s2, [#allocation4]  }
 0x254   :  { %254 = dma.done.wait [#allocation4], 16  }
 0x255   :  { %255 = vsyncadd [#allocation4], 4294967280 }
 0x256   :  { %161 = vsyncpa [#allocation3], 1 }
 0x257   :  { %162 = vsyncpa [#allocation6], 1 }
 0x258   :  { %163 = vsyncpa [#allocation4], 1 }

</bundles_post_ra>
